<compile_context>
chip_gen: v5e
topology: v5e:2x2
jax: 0.10.0
libtpu: 0.0.40
codegen_flags: <defaults>
</compile_context>

<pallas_src>
import functools

import jax
import jax.numpy as jnp
from jax.experimental import pallas as pl
from jax.experimental.pallas import tpu as pltpu


def dqn_kernel(x_ref, w1_ref, b1_ref, w2_ref, b2_ref, w3_ref, b3_ref, o_ref):
    # Layer 1: (TM, n_obs) @ (n_obs, H) -> f32 accumulate, bias add in f32.
    h1 = jnp.dot(x_ref[...], w1_ref[...],
                 preferred_element_type=jnp.float32) + b1_ref[...]
    # Layer 2: (TM, H) @ (H, H)
    h2 = jnp.dot(h1.astype(w2_ref.dtype), w2_ref[...],
                 preferred_element_type=jnp.float32) + b2_ref[...]
    # Layer 3: (TM, H) @ (H, N_pad)  (N padded to a 128-lane multiple)
    out = jnp.dot(h2.astype(w3_ref.dtype), w3_ref[...],
                  preferred_element_type=jnp.float32) + b3_ref[...]
    o_ref[...] = out.astype(o_ref.dtype)


def _round_up(x, m):
    return ((x + m - 1) // m) * m


@functools.partial(jax.jit, static_argnames=("compute_dtype", "tm"))
def dqn_forward(x, params, *, compute_dtype=None, tm=128):
    """x: (B, *dims); params: w1,b1,w2,b2,w3,b3 with weights stored (in, out).

    compute_dtype=jnp.bfloat16 halves HBM traffic / VMEM and uses the bf16 MXU
    path (accumulation, bias add and the final store stay in f32)."""
    B = x.shape[0]
    x_flat = x.reshape(B, -1)                      # nn.Flatten
    n_obs = x_flat.shape[1]

    w1, b1, w2, b2, w3, b3 = (params[k] for k in ("w1", "b1", "w2", "b2", "w3", "b3"))
    H = w1.shape[1]
    n_actions = w3.shape[1]
    n_pad = _round_up(n_actions, 128)              # lane-dense output slab

    # Pad layer-3 weight/bias so the kernel writes a (TM, n_pad) lane-dense tile.
    w3p = jnp.pad(w3, ((0, 0), (0, n_pad - n_actions)))
    b3p = jnp.pad(b3, ((0, 0), (0, n_pad - n_actions)))

    if compute_dtype is not None:
        x_flat = x_flat.astype(compute_dtype)
        w1 = w1.astype(compute_dtype)
        w2 = w2.astype(compute_dtype)
        w3p = w3p.astype(compute_dtype)
    # Biases stay f32 (added onto the f32 MXU accumulators).
    b1 = b1.astype(jnp.float32)
    b2 = b2.astype(jnp.float32)
    b3p = b3p.astype(jnp.float32)

    # --- batch tile size: keep the double-buffered x tile comfortably inside VMEM
    # (v7x has only 64 MiB physical / 32 MiB default scoped VMEM). ---
    x_itemsize = jnp.dtype(x_flat.dtype).itemsize
    tm_eff = max(8, tm)
    while tm_eff > 8 and 2 * tm_eff * n_obs * x_itemsize > (16 << 20):
        tm_eff //= 2

    b_pad = _round_up(max(B, tm_eff), tm_eff)
    if b_pad != B:
        x_flat = jnp.pad(x_flat, ((0, b_pad - B), (0, 0)))
    grid = (b_pad // tm_eff,)

    # --- VMEM budget estimate (double-buffered x/out tiles + resident weights). ---
    w_itemsize = jnp.dtype(w1.dtype).itemsize
    vmem_needed = (
        2 * tm_eff * n_obs * x_itemsize            # x tile, double buffered
        + 2 * tm_eff * n_pad * 4                   # f32 output tile, double buffered
        + (n_obs * H + H * H + H * n_pad) * w_itemsize
        + 3 * n_pad * 4                            # biases
        + 4 * tm_eff * H * 4                       # h1/h2 intermediates + slack
    )
    vmem_limit = min(int(vmem_needed) + (8 << 20), 100 << 20)

    cost = pl.CostEstimate(
        flops=2 * b_pad * (n_obs * H + H * H + H * n_pad),
        transcendentals=0,
        bytes_accessed=int(x_flat.size * x_itemsize
                           + (n_obs * H + H * H + H * n_pad) * w_itemsize
                           + (2 * H + n_pad) * 4
                           + b_pad * n_pad * 4),
    )

    resident = lambda i: (0, 0)                    # weights/biases stay in VMEM
    out_padded = pl.pallas_call(
        dqn_kernel,
        out_shape=jax.ShapeDtypeStruct((b_pad, n_pad), jnp.float32),
        grid=grid,
        in_specs=[
            pl.BlockSpec((tm_eff, n_obs), lambda i: (i, 0)),   # x: batch-tiled
            pl.BlockSpec((n_obs, H), resident),                # w1
            pl.BlockSpec((1, H), resident),                    # b1
            pl.BlockSpec((H, H), resident),                    # w2
            pl.BlockSpec((1, H), resident),                    # b2
            pl.BlockSpec((H, n_pad), resident),                # w3 (padded)
            pl.BlockSpec((1, n_pad), resident),                # b3 (padded)
        ],
        out_specs=pl.BlockSpec((tm_eff, n_pad), lambda i: (i, 0)),
        compiler_params=pltpu.CompilerParams(
            dimension_semantics=("parallel",),     # megacore split on v7x
            vmem_limit_bytes=vmem_limit,
        ),
        cost_estimate=cost,
    )(x_flat, w1, b1, w2, b2, w3p, b3p)

    # Slice the lane-dense slab back to the true output shape.
    return out_padded[:B, :n_actions]


def init_params(key, n_observations, n_actions, hidden=128, dtype=jnp.float32):
    """Deterministic PyTorch-style (uniform fan-in) init; weights stored (in, out)."""
    ks = jax.random.split(key, 6)

    def linear(kw, kb, fan_in, fan_out):
        bound = 1.0 / jnp.sqrt(fan_in)
        w = jax.random.uniform(kw, (fan_in, fan_out), dtype, -bound, bound)
        b = jax.random.uniform(kb, (1, fan_out), dtype, -bound, bound)
        return w, b

    w1, b1 = linear(ks[0], ks[1], n_observations, hidden)
    w2, b2 = linear(ks[2], ks[3], hidden, hidden)
    w3, b3 = linear(ks[4], ks[5], hidden, n_actions)
    return {"w1": w1, "b1": b1, "w2": w2, "b2": b2, "w3": w3, "b3": b3}


def dqn_reference(x, params):
    """Pure-JAX reference of the same forward pass (matches the PyTorch Sequential)."""
    B = x.shape[0]
    h = x.reshape(B, -1)
    h = h @ params["w1"] + params["b1"]
    h = h @ params["w2"] + params["b2"]
    return h @ params["w3"] + params["b3"]


if __name__ == "__main__":
    key = jax.random.PRNGKey(0)
    k_x, k_p = jax.random.split(key)

    # Small shapes: batch=8, per-sample dims (4, 8) -> n_observations=32, n_actions=8
    batch, dims = 8, (4, 8)
    n_observations = dims[0] * dims[1]
    n_actions = 8

    x = jax.random.normal(k_x, (batch,) + dims, dtype=jnp.float32)
    params = init_params(k_p, n_observations, n_actions)

    out = dqn_forward(x, params)
    out = jax.block_until_ready(out)

    ref = dqn_reference(x, params)
    assert out.shape == (batch, n_actions)
    assert jnp.allclose(out, ref, atol=1e-4, rtol=1e-4)

    # Also exercise a larger, tiled batch (grid > 1) for the pipelined path.
    xb = jax.random.normal(k_x, (512,) + dims, dtype=jnp.float32)
    outb = jax.block_until_ready(dqn_forward(xb, params))
    assert jnp.allclose(outb, dqn_reference(xb, params), atol=1e-4, rtol=1e-4)

    print("KERNEL_OK")
</pallas_src>

<mosaic_0001>
module attributes {stable_mosaic.version = 11 : i64} {
  func.func @dqn_kernel(%arg0: i32, %arg1: memref<128x32xf32, #tpu.memory_space<vmem>>, %arg2: memref<32x128xf32, #tpu.memory_space<vmem>>, %arg3: memref<1x128xf32, #tpu.memory_space<vmem>>, %arg4: memref<128x128xf32, #tpu.memory_space<vmem>>, %arg5: memref<1x128xf32, #tpu.memory_space<vmem>>, %arg6: memref<128x128xf32, #tpu.memory_space<vmem>>, %arg7: memref<1x128xf32, #tpu.memory_space<vmem>>, %arg8: memref<128x128xf32, #tpu.memory_space<vmem>>) attributes {dimension_semantics = [#tpu.dimension_semantics<parallel>], iteration_bounds = array<i64: 1>, scalar_prefetch = 0 : i64, scratch_operands = 0 : i64, tpu.core_type = #tpu.core_type<tc>, window_params = [{transform_indices = @transform_0, window_bounds = array<i64: 128, 32>}, {pipeline_mode = #tpu.pipeline_mode<synchronous>, transform_indices = @transform_1, window_bounds = array<i64: 32, 128>}, {pipeline_mode = #tpu.pipeline_mode<synchronous>, transform_indices = @transform_2, window_bounds = array<i64: 1, 128>}, {pipeline_mode = #tpu.pipeline_mode<synchronous>, transform_indices = @transform_3, window_bounds = array<i64: 128, 128>}, {pipeline_mode = #tpu.pipeline_mode<synchronous>, transform_indices = @transform_4, window_bounds = array<i64: 1, 128>}, {pipeline_mode = #tpu.pipeline_mode<synchronous>, transform_indices = @transform_5, window_bounds = array<i64: 128, 128>}, {pipeline_mode = #tpu.pipeline_mode<synchronous>, transform_indices = @transform_6, window_bounds = array<i64: 1, 128>}, {transform_indices = @transform_7, window_bounds = array<i64: 128, 128>}]} {
    %c0 = arith.constant 0 : index
    %c0_0 = arith.constant 0 : index
    %0 = vector.load %arg1[%c0, %c0_0] : memref<128x32xf32, #tpu.memory_space<vmem>>, vector<128x32xf32>
    %c0_1 = arith.constant 0 : index
    %c0_2 = arith.constant 0 : index
    %1 = vector.load %arg2[%c0_1, %c0_2] : memref<32x128xf32, #tpu.memory_space<vmem>>, vector<32x128xf32>
    %cst = arith.constant dense<0.000000e+00> : vector<128x128xf32>
    %2 = tpu.matmul %0, %1, %cst {dimension_numbers = #tpu.dot_dimension_numbers<[1], [0], [0], [1], [0, 0, 1, 1], [], []>} : vector<128x32xf32>, vector<32x128xf32>, vector<128x128xf32> -> vector<128x128xf32>
    %c0_3 = arith.constant 0 : index
    %c0_4 = arith.constant 0 : index
    %3 = vector.load %arg3[%c0_3, %c0_4] : memref<1x128xf32, #tpu.memory_space<vmem>>, vector<1x128xf32>
    %4 = vector.broadcast %3 : vector<1x128xf32> to vector<128x128xf32>
    %5 = arith.addf %2, %4 : vector<128x128xf32>
    %c0_5 = arith.constant 0 : index
    %c0_6 = arith.constant 0 : index
    %6 = vector.load %arg4[%c0_5, %c0_6] : memref<128x128xf32, #tpu.memory_space<vmem>>, vector<128x128xf32>
    %cst_7 = arith.constant dense<0.000000e+00> : vector<128x128xf32>
    %7 = tpu.matmul %5, %6, %cst_7 {dimension_numbers = #tpu.dot_dimension_numbers<[1], [0], [0], [1], [0, 0, 1, 1], [], []>} : vector<128x128xf32>, vector<128x128xf32>, vector<128x128xf32> -> vector<128x128xf32>
    %c0_8 = arith.constant 0 : index
    %c0_9 = arith.constant 0 : index
    %8 = vector.load %arg5[%c0_8, %c0_9] : memref<1x128xf32, #tpu.memory_space<vmem>>, vector<1x128xf32>
    %9 = vector.broadcast %8 : vector<1x128xf32> to vector<128x128xf32>
    %10 = arith.addf %7, %9 : vector<128x128xf32>
    %c0_10 = arith.constant 0 : index
    %c0_11 = arith.constant 0 : index
    %11 = vector.load %arg6[%c0_10, %c0_11] : memref<128x128xf32, #tpu.memory_space<vmem>>, vector<128x128xf32>
    %cst_12 = arith.constant dense<0.000000e+00> : vector<128x128xf32>
    %12 = tpu.matmul %10, %11, %cst_12 {dimension_numbers = #tpu.dot_dimension_numbers<[1], [0], [0], [1], [0, 0, 1, 1], [], []>} : vector<128x128xf32>, vector<128x128xf32>, vector<128x128xf32> -> vector<128x128xf32>
    %c0_13 = arith.constant 0 : index
    %c0_14 = arith.constant 0 : index
    %13 = vector.load %arg7[%c0_13, %c0_14] : memref<1x128xf32, #tpu.memory_space<vmem>>, vector<1x128xf32>
    %14 = vector.broadcast %13 : vector<1x128xf32> to vector<128x128xf32>
    %15 = arith.addf %12, %14 : vector<128x128xf32>
    %c0_15 = arith.constant 0 : index
    %c0_16 = arith.constant 0 : index
    %16 = vector.load %arg8[%c0_15, %c0_16] : memref<128x128xf32, #tpu.memory_space<vmem>>, vector<128x128xf32>
    tpu.vector_store %arg8[%c0_15, %c0_16], %15 {strides = array<i32>} : memref<128x128xf32, #tpu.memory_space<vmem>>, vector<128x128xf32>,
    return
  }
  func.func @transform_0(%arg0: i32) -> (i32, i32) {
    %c0_i32 = arith.constant 0 : i32
    %c0_i32_0 = arith.constant 0 : i32
    return %arg0, %c0_i32 : i32, i32
  }
  func.func @transform_1(%arg0: i32) -> (i32, i32) {
    %c0_i32 = arith.constant 0 : i32
    %c0_i32_0 = arith.constant 0 : i32
    %c0_i32_1 = arith.constant 0 : i32
    return %c0_i32, %c0_i32_0 : i32, i32
  }
  func.func @transform_2(%arg0: i32) -> (i32, i32) {
    %c0_i32 = arith.constant 0 : i32
    %c0_i32_0 = arith.constant 0 : i32
    %c0_i32_1 = arith.constant 0 : i32
    return %c0_i32, %c0_i32_0 : i32, i32
  }
  func.func @transform_3(%arg0: i32) -> (i32, i32) {
    %c0_i32 = arith.constant 0 : i32
    %c0_i32_0 = arith.constant 0 : i32
    %c0_i32_1 = arith.constant 0 : i32
    return %c0_i32, %c0_i32_0 : i32, i32
  }
  func.func @transform_4(%arg0: i32) -> (i32, i32) {
    %c0_i32 = arith.constant 0 : i32
    %c0_i32_0 = arith.constant 0 : i32
    %c0_i32_1 = arith.constant 0 : i32
    return %c0_i32, %c0_i32_0 : i32, i32
  }
  func.func @transform_5(%arg0: i32) -> (i32, i32) {
    %c0_i32 = arith.constant 0 : i32
    %c0_i32_0 = arith.constant 0 : i32
    %c0_i32_1 = arith.constant 0 : i32
    return %c0_i32, %c0_i32_0 : i32, i32
  }
  func.func @transform_6(%arg0: i32) -> (i32, i32) {
    %c0_i32 = arith.constant 0 : i32
    %c0_i32_0 = arith.constant 0 : i32
    %c0_i32_1 = arith.constant 0 : i32
    return %c0_i32, %c0_i32_0 : i32, i32
  }
  func.func @transform_7(%arg0: i32) -> (i32, i32) {
    %c0_i32 = arith.constant 0 : i32
    %c0_i32_0 = arith.constant 0 : i32
    return %arg0, %c0_i32 : i32, i32
  }
}

</mosaic_0001>

<bundles_post_ra>
// kernel: dqn_forward.1
= control target key start
LH: loop header
LB: loop body
LE: loop exit
PB: predicated region body
PF: predicated region fallthrough
CT: control target
= control target key end

     0   :  { %vm50_vm0 = vcmask 261120   ;;  %s692_s1 = inlined_call_operand.vmem [shape: f32[32,128], index: 1, kind: input, shape index: {}]   ;;  %s693_s0 = inlined_call_operand.vmem [shape: f32[128,32], index: 0, kind: input, shape index: {}]   ;;  %s694_s2 = inlined_call_operand.vmem [shape: f32[1,128], index: 2, kind: input, shape index: {}]   ;;  %s695_s3 = inlined_call_operand.vmem [shape: f32[128,128], index: 3, kind: input, shape index: {}]   ;;  %s696_s4 = inlined_call_operand.vmem [shape: f32[1,128], index: 4, kind: input, shape index: {}]   ;;  %s697_s5 = inlined_call_operand.vmem [shape: f32[128,128], index: 5, kind: input, shape index: {}]   ;;  %s698_s6 = inlined_call_operand.vmem [shape: f32[1,128], index: 6, kind: input, shape index: {}]   ;;  %s699_s7 = inlined_call_operand.vmem [shape: f32[128,128], index: 7, kind: output, shape index: {}]  }
   0x1   :  { %v45_v0 = vld [vmem:[%s692_s1 + $0x18] sm:$0xff]  ;;  %v44_v1 = vld [vmem:[%s692_s1 + $0x10] sm:$0xff]  ;;  %v43_v2 = vld [vmem:[%s692_s1 + $0x8] sm:$0xff] }
   0x2   :  { %111 = vmatpush.msra.mxu0 %v45_v0  ;;  %v42_v3 = vld [vmem:[%s692_s1] sm:$0xff]  ;;  %v27_v5 = vld [vmem:[%s693_s0 + $0x8] sm:$0xff]  ;;  %v28_v6 = vld [vmem:[%s693_s0 + $0x10] sm:$0xff] }
   0x3   :  { %v26_v4 = vld [vmem:[%s693_s0] sm:$0xff]  ;;  %v29_v7 = vld [vmem:[%s693_s0 + $0x18] sm:$0xff]  ;;  %v31_v9 = vld [vmem:[%s693_s0 + $0x28] sm:$0xff] }
   0x4   :  { %112 = vmatpush.msra.mxu0 %v44_v1  ;;  %v30_v8 = vld [vmem:[%s693_s0 + $0x20] sm:$0xff]  ;;  %v32_v10 = vld [vmem:[%s693_s0 + $0x30] sm:$0xff]  ;;  %v33_v11 = vld [vmem:[%s693_s0 + $0x38] sm:$0xff] }
   0x5   :  { %v34_v12 = vld [vmem:[%s693_s0 + $0x40] sm:$0xff]  ;;  %v179_v13 = vld [vmem:[%s695_s3 + $0x78] sm:$0xff]  ;;  %v178_v14 = vld [vmem:[%s695_s3 + $0x70] sm:$0xff] }
   0x6   :  { %113 = vmatpush.msra.mxu0 %v43_v2  ;;  %184 = vmatpush.msra.mxu1 %v179_v13  ;;  %v177_v15 = vld [vmem:[%s695_s3 + $0x68] sm:$0xff]  ;;  %v176_v16 = vld [vmem:[%s695_s3 + $0x60] sm:$0xff]  ;;  %v175_v18 = vld [vmem:[%s695_s3 + $0x58] sm:$0xff] }
   0x7   :  { %370 = vmatpush.msra.mxu3 %v179_v13  ;;  %v35_v17 = vld [vmem:[%s693_s0 + $0x48] sm:$0xff]  ;;  %v174_v19 = vld [vmem:[%s695_s3 + $0x50] sm:$0xff]  ;;  %v172_v21 = vld [vmem:[%s695_s3 + $0x40] sm:$0xff] }
   0x8   :  { %114 = vmatpush.msra.mxu0 %v42_v3  ;;  %185 = vmatpush.msra.mxu1 %v178_v14  ;;  %v173_v20 = vld [vmem:[%s695_s3 + $0x48] sm:$0xff]  ;;  %v36_v22 = vld [vmem:[%s693_s0 + $0x50] sm:$0xff]  ;;  %v171_v23 = vld [vmem:[%s695_s3 + $0x38] sm:$0xff] }
   0x9   :  { %354 = vmatmul.msk.f32.vlgmr.msra.gmra.mxu0 %vm50_vm0, %v26_v4  ;;  %371 = vmatpush.msra.mxu3 %v178_v14  ;;  %v170_v24 = vld [vmem:[%s695_s3 + $0x30] sm:$0xff]  ;;  %v169_v25 = vld [vmem:[%s695_s3 + $0x28] sm:$0xff]  ;;  %v168_v26 = vld [vmem:[%s695_s3 + $0x20] sm:$0xff] }
   0xa   :  { %186 = vmatpush.msra.mxu1 %v177_v15  ;;  %v37_v27 = vld [vmem:[%s693_s0 + $0x58] sm:$0xff]  ;;  %v166_v29 = vld [vmem:[%s695_s3 + $0x10] sm:$0xff]  ;;  %v165_v30 = vld [vmem:[%s695_s3 + $0x8] sm:$0xff] }
   0xb   :  { %372 = vmatpush.msra.mxu3 %v177_v15  ;;  %v167_v28 = vld [vmem:[%s695_s3 + $0x18] sm:$0xff]  ;;  %v38_v31 = vld [vmem:[%s693_s0 + $0x60] sm:$0xff]  ;;  %v39_v33 = vld [vmem:[%s693_s0 + $0x68] sm:$0xff] }
   0xc   :  { %187 = vmatpush.msra.mxu1 %v176_v16  ;;  %v164_v32 = vld [vmem:[%s695_s3] sm:$0xff]  ;;  %v40_v34 = vld [vmem:[%s693_s0 + $0x70] sm:$0xff]  ;;  %v41_v35 = vld [vmem:[%s693_s0 + $0x78] sm:$0xff] }
   0xd   :  { %373 = vmatpush.msra.mxu3 %v176_v16  ;;  %v572_v36 = vld [vmem:[%s694_s2] ss:$0 sm:$0xff]  ;;  %v264_v55 = vld [vmem:[%s697_s5 + $0x78] sm:$0xff]  ;;  %v263_v56 = vld [vmem:[%s697_s5 + $0x70] sm:$0xff] }
   0xe   :  { %188 = vmatpush.msra.mxu1 %v175_v18  ;;  %269 = vmatpush.msra.mxu2 %v264_v55  ;;  %v262_v57 = vld [vmem:[%s697_s5 + $0x68] sm:$0xff]  ;;  %v261_v60 = vld [vmem:[%s697_s5 + $0x60] sm:$0xff]  ;;  %v260_v61 = vld [vmem:[%s697_s5 + $0x58] sm:$0xff] }
   0xf   :  { %374 = vmatpush.msra.mxu3 %v175_v18  ;;  %v259_v62 = vld [vmem:[%s697_s5 + $0x50] sm:$0xff]  ;;  %v258_v63 = vld [vmem:[%s697_s5 + $0x48] sm:$0xff]  ;;  %v257_v2 = vld [vmem:[%s697_s5 + $0x40] sm:$0xff] }
  0x10   :  { %189 = vmatpush.msra.mxu1 %v174_v19  ;;  %270 = vmatpush.msra.mxu2 %v263_v56  ;;  %v256_v3 = vld [vmem:[%s697_s5 + $0x38] sm:$0xff]  ;;  %v255_v4 = vld [vmem:[%s697_s5 + $0x30] sm:$0xff]  ;;  %v249_v14 = vld [vmem:[%s697_s5] sm:$0xff] }
  0x11   :  { %355 = vmatmul.msk.f32.gmra.mxu0 %vm50_vm0, %v27_v5  ;;  %375 = vmatpush.msra.mxu3 %v174_v19  ;;  %v254_v5 = vld [vmem:[%s697_s5 + $0x28] sm:$0xff] }
  0x12   :  { %190 = vmatpush.msra.mxu1 %v173_v20  ;;  %271 = vmatpush.msra.mxu2 %v262_v57 }
  0x13   :  { %376 = vmatpush.msra.mxu3 %v173_v20 }
  0x14   :  { %191 = vmatpush.msra.mxu1 %v172_v21  ;;  %272 = vmatpush.msra.mxu2 %v261_v60 }
  0x15   :  { %377 = vmatpush.msra.mxu3 %v172_v21  ;;  %v403_v21 = vld [vmem:[%s696_s4] ss:$0 sm:$0xff] }
  0x16   :  { %192 = vmatpush.msra.mxu1 %v171_v23  ;;  %273 = vmatpush.msra.mxu2 %v260_v61 }
  0x17   :  { %378 = vmatpush.msra.mxu3 %v171_v23 }
  0x18   :  { %193 = vmatpush.msra.mxu1 %v170_v24  ;;  %274 = vmatpush.msra.mxu2 %v259_v62 }
  0x19   :  { %356 = vmatmul.msk.f32.gmra.mxu0 %vm50_vm0, %v28_v6  ;;  %379 = vmatpush.msra.mxu3 %v170_v24 }
  0x1a   :  { %194 = vmatpush.msra.mxu1 %v169_v25  ;;  %275 = vmatpush.msra.mxu2 %v258_v63 }
  0x1b   :  { %380 = vmatpush.msra.mxu3 %v169_v25 }
  0x1c   :  { %195 = vmatpush.msra.mxu1 %v168_v26  ;;  %276 = vmatpush.msra.mxu2 %v257_v2 }
  0x1d   :  { %381 = vmatpush.msra.mxu3 %v168_v26 }
  0x1e   :  { %196 = vmatpush.msra.mxu1 %v167_v28  ;;  %277 = vmatpush.msra.mxu2 %v256_v3 }
  0x1f   :  { %382 = vmatpush.msra.mxu3 %v167_v28 }
  0x20   :  { %197 = vmatpush.msra.mxu1 %v166_v29  ;;  %278 = vmatpush.msra.mxu2 %v255_v4 }
  0x21   :  { %357 = vmatmul.msk.f32.gmra.mxu0 %vm50_vm0, %v29_v7  ;;  %383 = vmatpush.msra.mxu3 %v166_v29 }
  0x22   :  { %198 = vmatpush.msra.mxu1 %v165_v30  ;;  %279 = vmatpush.msra.mxu2 %v254_v5 }
  0x23   :  { %384 = vmatpush.msra.mxu3 %v165_v30 }
  0x24   :  { %199 = vmatpush.msra.mxu1 %v164_v32 }
  0x25   :  { %385 = vmatpush.msra.mxu3 %v164_v32 }
  0x27   :  { %386 = vmatpush.msrb.mxu3 %v264_v55 }
  0x29   :  { %358 = vmatmul.msk.f32.gmra.mxu0 %vm50_vm0, %v30_v8  ;;  %387 = vmatpush.msrb.mxu3 %v263_v56  ;;  %v253_v8 = vld [vmem:[%s697_s5 + $0x20] sm:$0xff] }
  0x2a   :  { %280 = vmatpush.msra.mxu2 %v253_v8 }
  0x2b   :  { %388 = vmatpush.msrb.mxu3 %v262_v57 }
  0x2d   :  { %389 = vmatpush.msrb.mxu3 %v261_v60 }
  0x2f   :  { %390 = vmatpush.msrb.mxu3 %v260_v61 }
  0x31   :  { %359 = vmatmul.msk.f32.gmra.mxu0 %vm50_vm0, %v31_v9  ;;  %391 = vmatpush.msrb.mxu3 %v259_v62  ;;  %v252_v9 = vld [vmem:[%s697_s5 + $0x18] sm:$0xff] }
  0x32   :  { %281 = vmatpush.msra.mxu2 %v252_v9 }
  0x33   :  { %392 = vmatpush.msrb.mxu3 %v258_v63 }
  0x35   :  { %393 = vmatpush.msrb.mxu3 %v257_v2 }
  0x37   :  { %394 = vmatpush.msrb.mxu3 %v256_v3 }
  0x39   :  { %360 = vmatmul.msk.f32.gmra.mxu0 %vm50_vm0, %v32_v10  ;;  %395 = vmatpush.msrb.mxu3 %v255_v4  ;;  %v251_v10 = vld [vmem:[%s697_s5 + $0x10] sm:$0xff] }
  0x3a   :  { %282 = vmatpush.msra.mxu2 %v251_v10 }
  0x3b   :  { %396 = vmatpush.msrb.mxu3 %v254_v5 }
  0x3d   :  { %397 = vmatpush.msrb.mxu3 %v253_v8 }
  0x3f   :  { %398 = vmatpush.msrb.mxu3 %v252_v9 }
  0x41   :  { %361 = vmatmul.msk.f32.gmra.mxu0 %vm50_vm0, %v33_v11  ;;  %399 = vmatpush.msrb.mxu3 %v251_v10  ;;  %v250_v11 = vld [vmem:[%s697_s5 + $0x8] sm:$0xff] }
  0x42   :  { %283 = vmatpush.msra.mxu2 %v250_v11 }
  0x43   :  { %400 = vmatpush.msrb.mxu3 %v250_v11 }
  0x44   :  { %284 = vmatpush.msra.mxu2 %v249_v14 }
  0x45   :  { %401 = vmatpush.msrb.mxu3 %v249_v14 }
  0x49   :  { %362 = vmatmul.msk.f32.gmra.mxu0 %vm50_vm0, %v34_v12 }
  0x51   :  { %363 = vmatmul.msk.f32.gmra.mxu0 %vm50_vm0, %v35_v17 }
  0x59   :  { %364 = vmatmul.msk.f32.gmra.mxu0 %vm50_vm0, %v36_v22 }
  0x61   :  { %365 = vmatmul.msk.f32.gmra.mxu0 %vm50_vm0, %v37_v27 }
  0x69   :  { %366 = vmatmul.msk.f32.gmra.mxu0 %vm50_vm0, %v38_v31 }
  0x71   :  { %367 = vmatmul.msk.f32.gmra.mxu0 %vm50_vm0, %v39_v33 }
  0x79   :  { %368 = vmatmul.msk.f32.gmra.mxu0 %vm50_vm0, %v40_v34 }
  0x81   :  { %369 = vmatmul.msk.f32.gmra.mxu0 %vm50_vm0, %v41_v35 }
  0x86   :  { %v116_v37 = vpop.f32.mrf.mxu0 }
  0x87   :  { %v117_v38 = vadd.f32 %v572_v36, %v116_v37 }
  0x89   :  { %200 = vmatmul.f32.vlgmr.msra.gmra.mxu1 %v117_v38 }
  0x8e   :  { %v119_v39 = vpop.f32.mrf.mxu0 }
  0x8f   :  { %v120_v40 = vadd.f32 %v572_v36, %v119_v39 }
  0x91   :  { %203 = vmatmul.f32.gmra.mxu1 %v120_v40 }
  0x96   :  { %v122_v41 = vpop.f32.mrf.mxu0 }
  0x97   :  { %v123_v42 = vadd.f32 %v572_v36, %v122_v41 }
  0x99   :  { %206 = vmatmul.f32.gmra.mxu1 %v123_v42 }
  0x9e   :  { %v125_v43 = vpop.f32.mrf.mxu0 }
  0x9f   :  { %v126_v44 = vadd.f32 %v572_v36, %v125_v43 }
  0xa1   :  { %209 = vmatmul.f32.gmra.mxu1 %v126_v44 }
  0xa6   :  { %v128_v45 = vpop.f32.mrf.mxu0 }
  0xa7   :  { %v129_v46 = vadd.f32 %v572_v36, %v128_v45 }
  0xa9   :  { %212 = vmatmul.f32.gmra.mxu1 %v129_v46 }
  0xae   :  { %v131_v47 = vpop.f32.mrf.mxu0 }
  0xaf   :  { %v132_v48 = vadd.f32 %v572_v36, %v131_v47 }
  0xb1   :  { %215 = vmatmul.f32.gmra.mxu1 %v132_v48 }
  0xb6   :  { %v134_v49 = vpop.f32.mrf.mxu0 }
  0xb7   :  { %v135_v50 = vadd.f32 %v572_v36, %v134_v49 }
  0xb9   :  { %218 = vmatmul.f32.gmra.mxu1 %v135_v50 }
  0xbe   :  { %v137_v51 = vpop.f32.mrf.mxu0 }
  0xbf   :  { %v138_v52 = vadd.f32 %v572_v36, %v137_v51 }
  0xc1   :  { %221 = vmatmul.f32.gmra.mxu1 %v138_v52 }
  0xc6   :  { %v140_v53 = vpop.f32.mrf.mxu0 }
  0xc7   :  { %v141_v54 = vadd.f32 %v572_v36, %v140_v53 }
  0xc9   :  { %224 = vmatmul.f32.gmra.mxu1 %v141_v54  ;;  %v404_v54 = vld [vmem:[%s698_s6] ss:$0 sm:$0xff] }
  0xce   :  { %v143_v58 = vpop.f32.mrf.mxu0 }
  0xcf   :  { %v144_v59 = vadd.f32 %v572_v36, %v143_v58 }
  0xd1   :  { %227 = vmatmul.f32.gmra.mxu1 %v144_v59 }
  0xd6   :  { %v146_v0 = vpop.f32.mrf.mxu0 }
  0xd7   :  { %v147_v1 = vadd.f32 %v572_v36, %v146_v0 }
  0xd9   :  { %230 = vmatmul.f32.gmra.mxu1 %v147_v1 }
  0xde   :  { %v149_v6 = vpop.f32.mrf.mxu0 }
  0xdf   :  { %v150_v7 = vadd.f32 %v572_v36, %v149_v6 }
  0xe1   :  { %233 = vmatmul.f32.gmra.mxu1 %v150_v7 }
  0xe6   :  { %v152_v12 = vpop.f32.mrf.mxu0 }
  0xe7   :  { %v153_v13 = vadd.f32 %v572_v36, %v152_v12 }
  0xe9   :  { %236 = vmatmul.f32.vlgmr.msra.gmra.mxu3 %v153_v13 }
  0xee   :  { %v155_v15 = vpop.f32.mrf.mxu0 }
  0xef   :  { %v156_v16 = vadd.f32 %v572_v36, %v155_v15 }
  0xf1   :  { %239 = vmatmul.f32.gmra.mxu3 %v156_v16 }
  0xf6   :  { %v158_v17 = vpop.f32.mrf.mxu0 }
  0xf7   :  { %v159_v18 = vadd.f32 %v572_v36, %v158_v17 }
  0xf9   :  { %242 = vmatmul.f32.gmra.mxu3 %v159_v18 }
  0xfe   :  { %v161_v19 = vpop.f32.mrf.mxu0 }
  0xff   :  { %v162_v20 = vadd.f32 %v572_v36, %v161_v19 }
 0x101   :  { %245 = vmatmul.f32.gmra.mxu3 %v162_v20 }
 0x106   :  { %v201_v22 = vpop.f32.mrf.mxu1 }
 0x107   :  { %v202_v23 = vadd.f32 %v403_v21, %v201_v22 }
 0x109   :  { %285 = vmatmul.f32.vlgmr.msra.gmra.mxu2 %v202_v23 }
 0x10e   :  { %v204_v24 = vpop.f32.mrf.mxu1 }
 0x10f   :  { %v205_v25 = vadd.f32 %v403_v21, %v204_v24 }
 0x111   :  { %288 = vmatmul.f32.gmra.mxu2 %v205_v25 }
 0x116   :  { %v207_v26 = vpop.f32.mrf.mxu1 }
 0x117   :  { %v208_v27 = vadd.f32 %v403_v21, %v207_v26 }
 0x119   :  { %291 = vmatmul.f32.gmra.mxu2 %v208_v27 }
 0x11e   :  { %v210_v28 = vpop.f32.mrf.mxu1 }
 0x11f   :  { %v211_v29 = vadd.f32 %v403_v21, %v210_v28 }
 0x121   :  { %294 = vmatmul.f32.gmra.mxu2 %v211_v29 }
 0x126   :  { %v213_v30 = vpop.f32.mrf.mxu1 }
 0x127   :  { %v214_v31 = vadd.f32 %v403_v21, %v213_v30 }
 0x129   :  { %297 = vmatmul.f32.gmra.mxu2 %v214_v31 }
 0x12e   :  { %v216_v32 = vpop.f32.mrf.mxu1 }
 0x12f   :  { %v217_v33 = vadd.f32 %v403_v21, %v216_v32 }
 0x131   :  { %300 = vmatmul.f32.gmra.mxu2 %v217_v33 }
 0x136   :  { %v219_v34 = vpop.f32.mrf.mxu1 }
 0x137   :  { %v220_v35 = vadd.f32 %v403_v21, %v219_v34 }
 0x139   :  { %303 = vmatmul.f32.gmra.mxu2 %v220_v35 }
 0x13e   :  { %v222_v36 = vpop.f32.mrf.mxu1 }
 0x13f   :  { %v223_v37 = vadd.f32 %v403_v21, %v222_v36 }
 0x141   :  { %306 = vmatmul.f32.gmra.mxu2 %v223_v37 }
 0x146   :  { %v225_v38 = vpop.f32.mrf.mxu1 }
 0x147   :  { %v226_v39 = vadd.f32 %v403_v21, %v225_v38 }
 0x149   :  { %309 = vmatmul.f32.gmra.mxu2 %v226_v39 }
 0x14e   :  { %v228_v40 = vpop.f32.mrf.mxu1 }
 0x14f   :  { %v229_v41 = vadd.f32 %v403_v21, %v228_v40 }
 0x151   :  { %312 = vmatmul.f32.gmra.mxu2 %v229_v41 }
 0x156   :  { %v231_v42 = vpop.f32.mrf.mxu1 }
 0x157   :  { %v232_v43 = vadd.f32 %v403_v21, %v231_v42 }
 0x159   :  { %315 = vmatmul.f32.gmra.mxu2 %v232_v43 }
 0x15e   :  { %v234_v44 = vpop.f32.mrf.mxu1 }
 0x15f   :  { %v235_v45 = vadd.f32 %v403_v21, %v234_v44 }
 0x161   :  { %318 = vmatmul.f32.gmra.mxu2 %v235_v45 }
 0x16c   :  { %v237_v46 = vpop.f32.mrf.mxu3 }
 0x16d   :  { %v238_v47 = vadd.f32 %v403_v21, %v237_v46 }
 0x16f   :  { %321 = vmatmul.f32.vlgmr.msrb.gmra.mxu3 %v238_v47 }
 0x174   :  { %v240_v48 = vpop.f32.mrf.mxu3 }
 0x175   :  { %v241_v49 = vadd.f32 %v403_v21, %v240_v48 }
 0x177   :  { %324 = vmatmul.f32.gmra.mxu3 %v241_v49 }
 0x17c   :  { %v243_v50 = vpop.f32.mrf.mxu3 }
 0x17d   :  { %v244_v51 = vadd.f32 %v403_v21, %v243_v50 }
 0x17f   :  { %327 = vmatmul.f32.gmra.mxu3 %v244_v51 }
 0x184   :  { %v246_v52 = vpop.f32.mrf.mxu3 }
 0x185   :  { %v247_v53 = vadd.f32 %v403_v21, %v246_v52 }
 0x187   :  { %330 = vmatmul.f32.gmra.mxu3 %v247_v53 }
 0x18c   :  { %v286_v55 = vpop.f32.mrf.mxu2 }
 0x18d   :  { %v287_v56 = vadd.f32 %v404_v54, %v286_v55 }
 0x18f   :  { %334 = vst [vmem:[%s699_s7] sm:$0xff] %v287_v56 }
 0x194   :  { %v289_v57 = vpop.f32.mrf.mxu2 }
 0x195   :  { %v290_v58 = vadd.f32 %v404_v54, %v289_v57 }
 0x197   :  { %335 = vst [vmem:[%s699_s7 + $0x8] sm:$0xff] %v290_v58 }
 0x19c   :  { %v292_v59 = vpop.f32.mrf.mxu2 }
 0x19d   :  { %v293_v60 = vadd.f32 %v404_v54, %v292_v59 }
 0x19f   :  { %336 = vst [vmem:[%s699_s7 + $0x10] sm:$0xff] %v293_v60 }
 0x1a4   :  { %v295_v61 = vpop.f32.mrf.mxu2 }
 0x1a5   :  { %v296_v62 = vadd.f32 %v404_v54, %v295_v61 }
 0x1a7   :  { %337 = vst [vmem:[%s699_s7 + $0x18] sm:$0xff] %v296_v62 }
 0x1ac   :  { %v298_v63 = vpop.f32.mrf.mxu2 }
 0x1ad   :  { %v299_v0 = vadd.f32 %v404_v54, %v298_v63 }
 0x1af   :  { %338 = vst [vmem:[%s699_s7 + $0x20] sm:$0xff] %v299_v0 }
 0x1b4   :  { %v301_v1 = vpop.f32.mrf.mxu2 }
 0x1b5   :  { %v302_v2 = vadd.f32 %v404_v54, %v301_v1 }
 0x1b7   :  { %339 = vst [vmem:[%s699_s7 + $0x28] sm:$0xff] %v302_v2 }
 0x1bc   :  { %v304_v3 = vpop.f32.mrf.mxu2 }
 0x1bd   :  { %v305_v4 = vadd.f32 %v404_v54, %v304_v3 }
 0x1bf   :  { %340 = vst [vmem:[%s699_s7 + $0x30] sm:$0xff] %v305_v4 }
 0x1c4   :  { %v307_v5 = vpop.f32.mrf.mxu2 }
 0x1c5   :  { %v308_v6 = vadd.f32 %v404_v54, %v307_v5 }
 0x1c7   :  { %341 = vst [vmem:[%s699_s7 + $0x38] sm:$0xff] %v308_v6 }
 0x1cc   :  { %v310_v7 = vpop.f32.mrf.mxu2 }
 0x1cd   :  { %v311_v8 = vadd.f32 %v404_v54, %v310_v7 }
 0x1cf   :  { %342 = vst [vmem:[%s699_s7 + $0x40] sm:$0xff] %v311_v8 }
 0x1d4   :  { %v313_v9 = vpop.f32.mrf.mxu2 }
 0x1d5   :  { %v314_v10 = vadd.f32 %v404_v54, %v313_v9 }
 0x1d7   :  { %343 = vst [vmem:[%s699_s7 + $0x48] sm:$0xff] %v314_v10 }
 0x1dc   :  { %v316_v11 = vpop.f32.mrf.mxu2 }
 0x1dd   :  { %v317_v12 = vadd.f32 %v404_v54, %v316_v11 }
 0x1df   :  { %344 = vst [vmem:[%s699_s7 + $0x50] sm:$0xff] %v317_v12 }
 0x1e4   :  { %v319_v13 = vpop.f32.mrf.mxu2 }
 0x1e5   :  { %v320_v14 = vadd.f32 %v404_v54, %v319_v13 }
 0x1e7   :  { %345 = vst [vmem:[%s699_s7 + $0x58] sm:$0xff] %v320_v14 }
 0x1f2   :  { %v322_v15 = vpop.f32.mrf.mxu3 }
 0x1f3   :  { %v323_v16 = vadd.f32 %v404_v54, %v322_v15 }
 0x1f5   :  { %346 = vst [vmem:[%s699_s7 + $0x60] sm:$0xff] %v323_v16 }
 0x1fa   :  { %v325_v17 = vpop.f32.mrf.mxu3 }
 0x1fb   :  { %v326_v18 = vadd.f32 %v404_v54, %v325_v17 }
 0x1fd   :  { %347 = vst [vmem:[%s699_s7 + $0x68] sm:$0xff] %v326_v18 }
 0x202   :  { %v328_v19 = vpop.f32.mrf.mxu3 }
 0x203   :  { %v329_v20 = vadd.f32 %v404_v54, %v328_v19 }
 0x205   :  { %348 = vst [vmem:[%s699_s7 + $0x70] sm:$0xff] %v329_v20 }
 0x20a   :  { %v331_v21 = vpop.f32.mrf.mxu3 }
 0x20b   :  { %v332_v22 = vadd.f32 %v404_v54, %v331_v21 }
 0x20d   :  { %349 = vst [vmem:[%s699_s7 + $0x78] sm:$0xff] %v332_v22 }

</bundles_post_ra>
